<compile_context>
chip_gen: v5e
topology: v5e:2x2
jax: 0.10.0
libtpu: 0.0.40
codegen_flags: <defaults>
</compile_context>

<pallas_src>
import jax
import jax.numpy as jnp
from jax.experimental import pallas as pl
from jax.experimental.pallas import tpu as pltpu

K_IN = 784    # 28 * 28
H = 256       # hidden width
_ALIGN = 16   # sublane alignment safe for both f32 and bf16 x tiles


def _discriminator_kernel(x_ref, w0_ref, b0_ref, w1_ref, b1_ref, o_ref):
    # ---- fc0: Linear(784 -> 256), bf16 MXU inputs, f32 accumulation ----
    x = x_ref[...].astype(jnp.bfloat16)          # cast on the VMEM tile only
    h = jnp.dot(x, w0_ref[...], preferred_element_type=jnp.float32)
    h = h + b0_ref[...]                          # (1, 256) bias broadcast, f32
    h = jnp.where(h > 0, h, 0.2 * h)             # LeakyReLU(0.2) on VPU

    # Dropout(0.3): eval-mode identity.
    # TODO(synk): training-mode dropout would use pltpu.prng_seed / prng_random_bits.

    # ---- fc3: Linear(256 -> 1) as VPU multiply + cross-lane reduce ----
    # (avoids a lane-sparse (256,1) MXU result)
    logit = jnp.sum(h * w1_ref[...], axis=-1, keepdims=True) + b1_ref[0]

    # Sigmoid; exp(-logit) -> inf gives the correct 0.0 limit in f32.
    o_ref[...] = 1.0 / (1.0 + jnp.exp(-logit))


def discriminator_forward(x, w0, b0, w1, b1, *, block_b=1024):
    """x: (B, 1, 28, 28) or (B, 784).  Returns (B, 1) float32 (eval-mode)."""
    x2d = x.reshape(-1, K_IN)                    # == x.view(-1, 784), free
    if x2d.dtype != jnp.bfloat16:                # bf16 x passes straight through
        x2d = x2d.astype(jnp.float32)            # no-op if already f32
    B = x2d.shape[0]

    # Batch tile: large enough to amortize per-step overhead; when the whole
    # batch fits in one tile, split it so both v7x TensorCores get work.
    TB = max(_ALIGN, (int(block_b) // _ALIGN) * _ALIGN)
    if B <= TB:
        TB = max(_ALIGN, ((pl.cdiv(B, 2) + _ALIGN - 1) // _ALIGN) * _ALIGN)
    num_tiles = pl.cdiv(B, TB)                   # ragged last tile is OK

    # Tiny one-time weight prep (w0 ~0.4 MiB in bf16, DMA'd once, VMEM-resident).
    w0_bf = w0.astype(jnp.bfloat16)                      # (784, 256)
    b0_row = b0.reshape(1, H).astype(jnp.float32)        # (1, 256)
    w1_row = w1.reshape(1, H).astype(jnp.float32)        # (1, 256)
    b1_s = b1.reshape(1).astype(jnp.float32)             # SMEM scalar

    return pl.pallas_call(
        _discriminator_kernel,
        out_shape=jax.ShapeDtypeStruct((B, 1), jnp.float32),
        grid=(num_tiles,),
        in_specs=[
            pl.BlockSpec((TB, K_IN), lambda i: (i, 0)),          # x tile
            pl.BlockSpec((K_IN, H), lambda i: (0, 0)),           # w0 (resident)
            pl.BlockSpec((1, H), lambda i: (0, 0)),              # b0 row
            pl.BlockSpec((1, H), lambda i: (0, 0)),              # w1 row
            pl.BlockSpec(memory_space=pltpu.MemorySpace.SMEM),   # b1 scalar
        ],
        out_specs=pl.BlockSpec((TB, 1), lambda i: (i, 0)),
        compiler_params=pltpu.CompilerParams(
            dimension_semantics=("parallel",),       # shard batch tiles across TCs
            vmem_limit_bytes=32 * 1024 * 1024,       # headroom for TB up to ~2048
        ),
    )(x2d, w0_bf, b0_row, w1_row, b1_s)


def init_params(key):
    """nn.Linear-style init: U(-1/sqrt(fan_in), +1/sqrt(fan_in))."""
    k0, k1, k2, k3 = jax.random.split(key, 4)
    bound0 = 1.0 / jnp.sqrt(float(K_IN))
    bound1 = 1.0 / jnp.sqrt(float(H))
    # Stored as (in_features, out_features) so the kernel computes x @ W.
    w0 = jax.random.uniform(k0, (K_IN, H), jnp.float32, -bound0, bound0)
    b0 = jax.random.uniform(k1, (H,), jnp.float32, -bound0, bound0)
    w1 = jax.random.uniform(k2, (H, 1), jnp.float32, -bound1, bound1)
    b1 = jax.random.uniform(k3, (1,), jnp.float32, -bound1, bound1)
    return w0, b0, w1, b1


def _reference(x, w0, b0, w1, b1):
    # Matches the kernel's precision split: bf16 MXU inputs, f32 everywhere else.
    x2d = x.reshape(-1, K_IN)
    h = jnp.dot(x2d.astype(jnp.bfloat16), w0.astype(jnp.bfloat16),
                preferred_element_type=jnp.float32) + b0
    h = jnp.where(h > 0, h, 0.2 * h)
    logit = h @ w1 + b1
    return jax.nn.sigmoid(logit)


if __name__ == "__main__":
    key = jax.random.PRNGKey(0)
    kx, kp = jax.random.split(key)

    # MNIST-like batch (B, C, H, W) = (20, 1, 28, 28) -> flattens to (20, 784).
    # B=20 exercises the two-tile "parallel" grid and the ragged last block.
    x = jax.random.normal(kx, (20, 1, 28, 28), jnp.float32)
    w0, b0, w1, b1 = init_params(kp)

    out = jax.jit(discriminator_forward)(x, w0, b0, w1, b1)
    out = jax.block_until_ready(out)

    ref = _reference(x, w0, b0, w1, b1)
    assert out.shape == (20, 1), out.shape
    assert bool(jnp.all(jnp.isfinite(out))), "non-finite output"
    assert jnp.allclose(out, ref, atol=2e-4, rtol=1e-3), (out, ref)
    print("KERNEL_OK")
</pallas_src>

<mosaic_0001>
module attributes {stable_mosaic.version = 11 : i64} {
  func.func @_discriminator_kernel(%arg0: i32, %arg1: memref<16x784xf32, #tpu.memory_space<vmem>>, %arg2: memref<784x256xbf16, #tpu.memory_space<vmem>>, %arg3: memref<1x256xf32, #tpu.memory_space<vmem>>, %arg4: memref<1x256xf32, #tpu.memory_space<vmem>>, %arg5: memref<1xf32, #tpu.memory_space<smem>>, %arg6: memref<16x1xf32, #tpu.memory_space<vmem>>) attributes {dimension_semantics = [#tpu.dimension_semantics<parallel>], iteration_bounds = array<i64: 2>, scalar_prefetch = 0 : i64, scratch_operands = 0 : i64, tpu.core_type = #tpu.core_type<tc>, window_params = [{transform_indices = @transform_0, window_bounds = array<i64: 16, 784>}, {pipeline_mode = #tpu.pipeline_mode<synchronous>, transform_indices = @transform_1, window_bounds = array<i64: 784, 256>}, {pipeline_mode = #tpu.pipeline_mode<synchronous>, transform_indices = @transform_2, window_bounds = array<i64: 1, 256>}, {pipeline_mode = #tpu.pipeline_mode<synchronous>, transform_indices = @transform_3, window_bounds = array<i64: 1, 256>}, {transform_indices = @transform_4, window_bounds = array<i64: 1>}, {transform_indices = @transform_5, window_bounds = array<i64: 16, 1>}]} {
    %c0 = arith.constant 0 : index
    %c0_0 = arith.constant 0 : index
    %0 = vector.load %arg1[%c0, %c0_0] : memref<16x784xf32, #tpu.memory_space<vmem>>, vector<16x784xf32>
    %1 = arith.truncf %0 : vector<16x784xf32> to vector<16x784xbf16>
    %c0_1 = arith.constant 0 : index
    %c0_2 = arith.constant 0 : index
    %2 = vector.load %arg2[%c0_1, %c0_2] : memref<784x256xbf16, #tpu.memory_space<vmem>>, vector<784x256xbf16>
    %cst = arith.constant dense<0.000000e+00> : vector<16x256xf32>
    %3 = tpu.matmul %1, %2, %cst {dimension_numbers = #tpu.dot_dimension_numbers<[1], [0], [0], [1], [0, 0, 1, 1], [], []>} : vector<16x784xbf16>, vector<784x256xbf16>, vector<16x256xf32> -> vector<16x256xf32>
    %c0_3 = arith.constant 0 : index
    %c0_4 = arith.constant 0 : index
    %4 = vector.load %arg3[%c0_3, %c0_4] : memref<1x256xf32, #tpu.memory_space<vmem>>, vector<1x256xf32>
    %5 = vector.broadcast %4 : vector<1x256xf32> to vector<16x256xf32>
    %6 = arith.addf %3, %5 : vector<16x256xf32>
    %cst_5 = arith.constant 0.000000e+00 : f32
    %7 = vector.broadcast %cst_5 : f32 to vector<16x256xf32>
    %8 = arith.cmpf ogt, %6, %7 : vector<16x256xf32>
    %cst_6 = arith.constant 2.000000e-01 : f32
    %9 = vector.broadcast %cst_6 : f32 to vector<16x256xf32>
    %10 = arith.mulf %9, %6 : vector<16x256xf32>
    %11 = arith.select %8, %6, %10 : vector<16x256xi1>, vector<16x256xf32>
    %c0_7 = arith.constant 0 : index
    %c0_8 = arith.constant 0 : index
    %12 = vector.load %arg4[%c0_7, %c0_8] : memref<1x256xf32, #tpu.memory_space<vmem>>, vector<1x256xf32>
    %13 = vector.broadcast %12 : vector<1x256xf32> to vector<16x256xf32>
    %14 = arith.mulf %11, %13 : vector<16x256xf32>
    %cst_9 = arith.constant dense<0.000000e+00> : vector<16xf32>
    %15 = vector.multi_reduction <add>, %14, %cst_9 [1] : vector<16x256xf32> to vector<16xf32>
    %16 = vector.shape_cast %15 : vector<16xf32> to vector<16x1xf32>
    %c0_10 = arith.constant 0 : index
    %17 = memref.load %arg5[%c0_10] : memref<1xf32, #tpu.memory_space<smem>>
    %18 = vector.broadcast %17 : f32 to vector<16x1xf32>
    %19 = arith.addf %16, %18 : vector<16x1xf32>
    %cst_11 = arith.constant 0.000000e+00 : f32
    %20 = vector.broadcast %cst_11 : f32 to vector<16x1xf32>
    %21 = arith.subf %20, %19 : vector<16x1xf32>
    %22 = math.exp %21 : vector<16x1xf32>
    %cst_12 = arith.constant 1.000000e+00 : f32
    %23 = vector.broadcast %cst_12 : f32 to vector<16x1xf32>
    %24 = arith.addf %23, %22 : vector<16x1xf32>
    %cst_13 = arith.constant 1.000000e+00 : f32
    %25 = vector.broadcast %cst_13 : f32 to vector<16x1xf32>
    %26 = arith.divf %25, %24 : vector<16x1xf32>
    %c0_14 = arith.constant 0 : index
    %c0_15 = arith.constant 0 : index
    %27 = vector.load %arg6[%c0_14, %c0_15] : memref<16x1xf32, #tpu.memory_space<vmem>>, vector<16x1xf32>
    tpu.vector_store %arg6[%c0_14, %c0_15], %26 {strides = array<i32>} : memref<16x1xf32, #tpu.memory_space<vmem>>, vector<16x1xf32>,
    return
  }
  func.func @transform_0(%arg0: i32) -> (i32, i32) {
    %c0_i32 = arith.constant 0 : i32
    %c0_i32_0 = arith.constant 0 : i32
    return %arg0, %c0_i32 : i32, i32
  }
  func.func @transform_1(%arg0: i32) -> (i32, i32) {
    %c0_i32 = arith.constant 0 : i32
    %c0_i32_0 = arith.constant 0 : i32
    %c0_i32_1 = arith.constant 0 : i32
    return %c0_i32, %c0_i32_0 : i32, i32
  }
  func.func @transform_2(%arg0: i32) -> (i32, i32) {
    %c0_i32 = arith.constant 0 : i32
    %c0_i32_0 = arith.constant 0 : i32
    %c0_i32_1 = arith.constant 0 : i32
    return %c0_i32, %c0_i32_0 : i32, i32
  }
  func.func @transform_3(%arg0: i32) -> (i32, i32) {
    %c0_i32 = arith.constant 0 : i32
    %c0_i32_0 = arith.constant 0 : i32
    %c0_i32_1 = arith.constant 0 : i32
    return %c0_i32, %c0_i32_0 : i32, i32
  }
  func.func @transform_4(%arg0: i32) -> i32 {
    %c0_i32 = arith.constant 0 : i32
    %c0_i32_0 = arith.constant 0 : i32
    return %c0_i32 : i32
  }
  func.func @transform_5(%arg0: i32) -> (i32, i32) {
    %c0_i32 = arith.constant 0 : i32
    %c0_i32_0 = arith.constant 0 : i32
    return %arg0, %c0_i32 : i32, i32
  }
}

</mosaic_0001>

<bundles_post_ra>
// kernel: discriminator_forward.1
= control target key start
LH: loop header
LB: loop body
LE: loop exit
PB: predicated region body
PF: predicated region fallthrough
CT: control target
= control target key end

     0   :  { %s2826_s0 = inlined_call_operand.vmem [shape: f32[20,784], index: 0, kind: input, shape index: {}]   ;;  %s2827_s1 = inlined_call_operand.vmem [shape: bf16[784,256], index: 1, kind: input, shape index: {}]   ;;  %s2828_s2 = inlined_call_operand.vmem [shape: f32[1,256], index: 2, kind: input, shape index: {}]   ;;  %s2829_s3 = inlined_call_operand.vmem [shape: f32[1,256], index: 3, kind: input, shape index: {}]   ;;  %s2830_s4 = inlined_call_operand.<no memory space> [shape: f32[1], index: 4, kind: input, shape index: {}]   ;;  %s2831_s5 = inlined_call_operand.vmem [shape: f32[20,1], index: 5, kind: output, shape index: {}]  }
   0x1   :  { %10 = sst [smem:[#allocation2]] %s2830_s4 }
   0x2   :  { %s2101_s20 = smov 0   ;;  %s2103_s21 = smov 0  }
   0x3   :  { %s2105_s22 = smov 0  }
   0x4 LB: > { %s2114_s4 = sadd.s32 4294967295, %s2034_s22   ;;  %s2116_s23 = sadd.s32 1, %s2034_s22   ;;  %s2034_s22 = sphi %s2105_s22, %s2835_s22   ;;  %s2030_s21 = sphi %s2103_s21, %s2834_s21   ;;  %s2026_s20 = sphi %s2101_s20, %s2833_s20  }
   0x5   : > { %s130_s24 = ssub.s32 %s2034_s22, %s2116_s23  ;;  %s133_s25 = sadd.s32 1, %s2030_s21 }
   0x6   : > { %p131_p0 = scmp.eq.s32.totalorder %s130_s24, 0  ;;  %p143_p1 = scmp.ne.s32.totalorder %s2030_s21, %s2026_s20 }
   0x7   : > { %p144_p2 = scmp.eq.s32.totalorder %s2114_s4, 1  ;;  %p1367_p3 = scmp.ge.s32.totalorder %s2034_s22, 1 }
   0x8   : > { %s2124_s26 = scalar_select %p131_p0, %s2030_s21, %s133_s25  }
   0x9   : > { %p2126_p4 = por %p144_p2, %p143_p1  ;;  %p200_p5 = scmp.lt.s32.totalorder %s2034_s22, 3 }
   0xb   : > { %p201_p6 = pnand %p1367_p3, %p200_p5 }
   0xc   : > { %s2305_s19 = sshll.u32 (!%p201_p6), %s2114_s4, 1  ;;  %s230_s8 = sand.u32 (!%p201_p6), 1, %s2026_s20  }
   0xd   : > { %204 = sbr.rel (%p201_p6) target bundleno = 463 (0x1cf), region = 40  ;;  %p239_p7 = scmp.lt.s32.totalorder (!%p201_p6), %s2305_s19, 2 }
  0x12   : > { %v1429_v0 = vld [vmem:[%s2827_s1 + $0x70] sm:$0xf]  ;;  %v1797_v1 = vld [vmem:[%s2827_s1 + $0x74] sm:$0xf0]  ;;  %v1421_v11 = vld [vmem:[%s2827_s1 + $0x60] sm:$0xf] }
  0x13   : > { %v1557_v2 = vld [vmem:[%s2827_s1 + $0x170] sm:$0xf]  ;;  %v1430_v3 = vor.u32 %v1797_v1, %v1429_v0  ;;  %v1829_v4 = vld [vmem:[%s2827_s1 + $0x174] sm:$0xf0]  ;;  %v1795_v13 = vld [vmem:[%s2827_s1 + $0x64] sm:$0xf0] }
  0x14   : > { %v1621_v5 = vld [vmem:[%s2827_s1 + $0x1f0] sm:$0xf]  ;;  %v1845_v6 = vld [vmem:[%s2827_s1 + $0x1f4] sm:$0xf0]  ;;  %v1558_v7 = vor.u32 %v1829_v4, %v1557_v2  ;;  %v1549_v14 = vld [vmem:[%s2827_s1 + $0x160] sm:$0xf]  ;;  %v1422_v16 = vor.u32 %v1795_v13, %v1421_v11 }
  0x15   : > { %v1622_v8 = vor.u32 %v1845_v6, %v1621_v5  ;;  %v1493_v9 = vld [vmem:[%s2827_s1 + $0xf0] sm:$0xf]  ;;  %v1813_v10 = vld [vmem:[%s2827_s1 + $0xf4] sm:$0xf0]  ;;  %875 = vmatpush.bf16.msra.mxu0 %v1430_v3  ;;  %v1827_v15 = vld [vmem:[%s2827_s1 + $0x164] sm:$0xf0] }
  0x16   : > { %v1494_v12 = vor.u32 %v1813_v10, %v1493_v9  ;;  %903 = vmatpush.bf16.msra.mxu2 %v1558_v7  ;;  %v1550_v17 = vor.u32 %v1827_v15, %v1549_v14  ;;  %v1613_v18 = vld [vmem:[%s2827_s1 + $0x1e0] sm:$0xf]  ;;  %v1843_v19 = vld [vmem:[%s2827_s1 + $0x1e4] sm:$0xf0]  ;;  %v1413_v23 = vld [vmem:[%s2827_s1 + $0x50] sm:$0xf] }
  0x17   : > { %917 = vmatpush.bf16.msra.mxu3 %v1622_v8  ;;  %v1485_v20 = vld [vmem:[%s2827_s1 + $0xe0] sm:$0xf]  ;;  %v1614_v21 = vor.u32 %v1843_v19, %v1613_v18  ;;  %v1811_v22 = vld [vmem:[%s2827_s1 + $0xe4] sm:$0xf0]  ;;  %v1793_v24 = vld [vmem:[%s2827_s1 + $0x54] sm:$0xf0] }
  0x18   : > { %889 = vmatpush.bf16.msra.mxu1 %v1494_v12  ;;  %v1486_v25 = vor.u32 %v1811_v22, %v1485_v20  ;;  %v1541_v26 = vld [vmem:[%s2827_s1 + $0x150] sm:$0xf]  ;;  %v1825_v27 = vld [vmem:[%s2827_s1 + $0x154] sm:$0xf0]  ;;  %v1414_v29 = vor.u32 %v1793_v24, %v1413_v23  ;;  %v1405_v35 = vld [vmem:[%s2827_s1 + $0x40] sm:$0xf] }
  0x19   : > { %v1605_v28 = vld [vmem:[%s2827_s1 + $0x1d0] sm:$0xf]  ;;  %876 = vmatpush.bf16.msra.mxu0 %v1422_v16  ;;  %v1841_v30 = vld [vmem:[%s2827_s1 + $0x1d4] sm:$0xf0]  ;;  %v1542_v33 = vor.u32 %v1825_v27, %v1541_v26  ;;  %v1791_v36 = vld [vmem:[%s2827_s1 + $0x44] sm:$0xf0] }
  0x1a   : > { %v1477_v31 = vld [vmem:[%s2827_s1 + $0xd0] sm:$0xf]  ;;  %v1809_v32 = vld [vmem:[%s2827_s1 + $0xd4] sm:$0xf0]  ;;  %904 = vmatpush.bf16.msra.mxu2 %v1550_v17  ;;  %v1606_v34 = vor.u32 %v1841_v30, %v1605_v28  ;;  %v1533_v37 = vld [vmem:[%s2827_s1 + $0x140] sm:$0xf]  ;;  %v1406_v44 = vor.u32 %v1791_v36, %v1405_v35 }
  0x1b   : > { %918 = vmatpush.bf16.msra.mxu3 %v1614_v21  ;;  %v1478_v38 = vor.u32 %v1809_v32, %v1477_v31  ;;  %v1823_v39 = vld [vmem:[%s2827_s1 + $0x144] sm:$0xf0]  ;;  %v1597_v40 = vld [vmem:[%s2827_s1 + $0x1c0] sm:$0xf]  ;;  %v1397_v47 = vld [vmem:[%s2827_s1 + $0x30] sm:$0xf] }
  0x1c   : > { %890 = vmatpush.bf16.msra.mxu1 %v1486_v25  ;;  %v1839_v41 = vld [vmem:[%s2827_s1 + $0x1c4] sm:$0xf0]  ;;  %v1469_v42 = vld [vmem:[%s2827_s1 + $0xc0] sm:$0xf]  ;;  %v1534_v45 = vor.u32 %v1823_v39, %v1533_v37  ;;  %v1789_v48 = vld [vmem:[%s2827_s1 + $0x34] sm:$0xf0] }
  0x1d   : > { %v1807_v43 = vld [vmem:[%s2827_s1 + $0xc4] sm:$0xf0]  ;;  %877 = vmatpush.bf16.msra.mxu0 %v1414_v29  ;;  %v1598_v46 = vor.u32 %v1839_v41, %v1597_v40  ;;  %v1525_v49 = vld [vmem:[%s2827_s1 + $0x130] sm:$0xf]  ;;  %v1821_v51 = vld [vmem:[%s2827_s1 + $0x134] sm:$0xf0]  ;;  %v1398_v56 = vor.u32 %v1789_v48, %v1397_v47 }
  0x1e   : > { %905 = vmatpush.bf16.msra.mxu2 %v1542_v33  ;;  %v1470_v50 = vor.u32 %v1807_v43, %v1469_v42  ;;  %v1589_v52 = vld [vmem:[%s2827_s1 + $0x1b0] sm:$0xf]  ;;  %v1837_v53 = vld [vmem:[%s2827_s1 + $0x1b4] sm:$0xf0]  ;;  %v1526_v57 = vor.u32 %v1821_v51, %v1525_v49  ;;  %v1389_v59 = vld [vmem:[%s2827_s1 + $0x20] sm:$0xf] }
  0x1f   : > { %919 = vmatpush.bf16.msra.mxu3 %v1606_v34  ;;  %v1461_v54 = vld [vmem:[%s2827_s1 + $0xb0] sm:$0xf]  ;;  %v1805_v55 = vld [vmem:[%s2827_s1 + $0xb4] sm:$0xf0]  ;;  %v1590_v58 = vor.u32 %v1837_v53, %v1589_v52  ;;  %v1787_v60 = vld [vmem:[%s2827_s1 + $0x24] sm:$0xf0] }
  0x20   : > { %891 = vmatpush.bf16.msra.mxu1 %v1478_v38  ;;  %v1517_v61 = vld [vmem:[%s2827_s1 + $0x120] sm:$0xf]  ;;  %v1462_v62 = vor.u32 %v1805_v55, %v1461_v54  ;;  %v1819_v63 = vld [vmem:[%s2827_s1 + $0x124] sm:$0xf0]  ;;  %v1390_v4 = vor.u32 %v1787_v60, %v1389_v59  ;;  %v1381_v5 = vld [vmem:[%s2827_s1 + $0x10] sm:$0xf] }
  0x21   : > { %878 = vmatpush.bf16.msra.mxu0 %v1406_v44  ;;  %v1581_v0 = vld [vmem:[%s2827_s1 + $0x1a0] sm:$0xf]  ;;  %v1835_v1 = vld [vmem:[%s2827_s1 + $0x1a4] sm:$0xf0]  ;;  %v1785_v6 = vld [vmem:[%s2827_s1 + $0x14] sm:$0xf0]  ;;  %v1518_v7 = vor.u32 %v1819_v63, %v1517_v61 }
  0x22   : > { %906 = vmatpush.bf16.msra.mxu2 %v1534_v45  ;;  %v1453_v2 = vld [vmem:[%s2827_s1 + $0xa0] sm:$0xf]  ;;  %v1803_v3 = vld [vmem:[%s2827_s1 + $0xa4] sm:$0xf0]  ;;  %v1582_v8 = vor.u32 %v1835_v1, %v1581_v0  ;;  %v1509_v9 = vld [vmem:[%s2827_s1 + $0x110] sm:$0xf]  ;;  %v1382_v18 = vor.u32 %v1785_v6, %v1381_v5 }
  0x23   : > { %920 = vmatpush.bf16.msra.mxu3 %v1598_v46  ;;  %v1817_v10 = vld [vmem:[%s2827_s1 + $0x114] sm:$0xf0]  ;;  %v1573_v11 = vld [vmem:[%s2827_s1 + $0x190] sm:$0xf]  ;;  %v1454_v12 = vor.u32 %v1803_v3, %v1453_v2  ;;  %v1373_v16 = vld [vmem:[%s2827_s1] sm:$0xf] }
  0x24   : > { %892 = vmatpush.bf16.msra.mxu1 %v1470_v50  ;;  %v1833_v13 = vld [vmem:[%s2827_s1 + $0x194] sm:$0xf0]  ;;  %v1445_v14 = vld [vmem:[%s2827_s1 + $0x90] sm:$0xf]  ;;  %v1783_v17 = vld [vmem:[%s2827_s1 + $0x4] sm:$0xf0]  ;;  %v1510_v23 = vor.u32 %v1817_v10, %v1509_v9 }
  0x25   : > { %879 = vmatpush.bf16.msra.mxu0 %v1398_v56  ;;  %v1801_v15 = vld [vmem:[%s2827_s1 + $0x94] sm:$0xf0]  ;;  %v1501_v19 = vld [vmem:[%s2827_s1 + $0x100] sm:$0xf]  ;;  %v1815_v20 = vld [vmem:[%s2827_s1 + $0x104] sm:$0xf0]  ;;  %v1574_v24 = vor.u32 %v1833_v13, %v1573_v11  ;;  %v1374_v34 = vor.u32 %v1783_v17, %v1373_v16 }
  0x26   : > { %907 = vmatpush.bf16.msra.mxu2 %v1526_v57  ;;  %v1565_v21 = vld [vmem:[%s2827_s1 + $0x180] sm:$0xf]  ;;  %v1831_v22 = vld [vmem:[%s2827_s1 + $0x184] sm:$0xf0]  ;;  %v1685_v25 = vld [vmem:[%s2827_s1 + $0x270] sm:$0xf]  ;;  %v1446_v28 = vor.u32 %v1801_v15, %v1445_v14  ;;  %v1502_v37 = vor.u32 %v1815_v20, %v1501_v19 }
  0x27   : > { %921 = vmatpush.bf16.msra.mxu3 %v1590_v58  ;;  %v1861_v26 = vld [vmem:[%s2827_s1 + $0x274] sm:$0xf0]  ;;  %v1796_v27 = vld [vmem:[%s2827_s1 + $0x74] sm:$0xf]  ;;  %v1431_v29 = vld [vmem:[%s2827_s1 + $0x78] sm:$0xf0]  ;;  %v1566_v38 = vor.u32 %v1831_v22, %v1565_v21 }
  0x28   : > { %893 = vmatpush.bf16.msra.mxu1 %v1462_v62  ;;  %v1437_v30 = vld [vmem:[%s2827_s1 + $0x80] sm:$0xf]  ;;  %s240_s18 = scalar_select %p239_p7, %s2305_s19, 2  ;;  %v1799_v31 = vld [vmem:[%s2827_s1 + $0x84] sm:$0xf0]  ;;  %v1686_v42 = vor.u32 %v1861_v26, %v1685_v25  ;;  %v1434_v43 = vor.u32 %v1796_v27, %v1431_v29  ;;  %vm871_vm0 = vcmask 130048  }
  0x29   : > { %880 = vmatpush.bf16.msra.mxu0 %v1390_v4  ;;  %v1749_v32 = vld [vmem:[%s2827_s1 + $0x2f0] sm:$0xf]  ;;  %v1877_v33 = vld [vmem:[%s2827_s1 + $0x2f4] sm:$0xf0]  ;;  %v1757_v35 = vld [vmem:[%s2827_s1 + $0x300] sm:$0xf]  ;;  %v1438_v47 = vor.u32 %v1799_v31, %v1437_v30 }
  0x2a   : > { %908 = vmatpush.bf16.msra.mxu2 %v1518_v7  ;;  %s1883_s6 = smul.u32 56, %s240_s18  ;;  %v1879_v36 = vld [vmem:[%s2827_s1 + $0x304] sm:$0xf0]  ;;  %v1812_v39 = vld [vmem:[%s2827_s1 + $0xf4] sm:$0xf]  ;;  %v1750_v54 = vor.u32 %v1877_v33, %v1749_v32  ;;  %vm1141_vm7 = vcmask 7168  }
  0x2b   : > { %922 = vmatpush.bf16.msra.mxu3 %v1582_v8  ;;  %v1495_v40 = vld [vmem:[%s2827_s1 + $0xf8] sm:$0xf0]  ;;  %v1677_v41 = vld [vmem:[%s2827_s1 + $0x260] sm:$0xf]  ;;  %v1859_v44 = vld [vmem:[%s2827_s1 + $0x264] sm:$0xf0]  ;;  %v1758_v50 = vor.u32 %v1879_v36, %v1757_v35 }
  0x2c   : > { %894 = vmatpush.bf16.msra.mxu1 %v1454_v12  ;;  %s2363_s22 = scalar_lea.vmem %s2826_s0, %s1883_s6  ;;  %v1794_v45 = vld [vmem:[%s2827_s1 + $0x64] sm:$0xf]  ;;  %v1423_v46 = vld [vmem:[%s2827_s1 + $0x68] sm:$0xf0]  ;;  %v1741_v52 = vld [vmem:[%s2827_s1 + $0x2e0] sm:$0xf]  ;;  %v1498_v58 = vor.u32 %v1812_v39, %v1495_v40  ;;  %v1678_v0 = vor.u32 %v1859_v44, %v1677_v41 }
  0x2d   : > { %881 = vmatpush.bf16.msra.mxu0 %v1382_v18  ;;  %v258_v48 = vld [vmem:[%s2363_s22 + $0x10] sm:$0xff]  ;;  %v265_v49 = vld [vmem:[%s2363_s22 + $0x48] sm:$0xff]  ;;  %v256_v51 = vld [vmem:[%s2363_s22] sm:$0xff]  ;;  %v1426_v3 = vor.u32 %v1794_v45, %v1423_v46  ;;  %s1099_s6 = sld [smem:[#allocation2]]  ;;  %s1152_s20 = ssub.s32 (%p2126_p4), 3, %s2305_s19 }
  0x2e   : > { %909 = vmatpush.bf16.msra.mxu2 %v1510_v23  ;;  %v2380_v53 = vpack.c.bf16 %v265_v49, %v258_v48  ;;  %v263_v55 = vld [vmem:[%s2363_s22 + $0x38] sm:$0xff]  ;;  %v266_v57 = vld [vmem:[%s2363_s22 + $0x50] sm:$0xff]  ;;  %v257_v60 = vld [vmem:[%s2363_s22 + $0x8] sm:$0xff]  ;;  %s1880_s10 = sshll.u32 (%p2126_p4), %s2114_s4, 4  ;;  %p1153_p8 = scmp.lt.s32.totalorder (%p2126_p4), %s1152_s20, 2 }
  0x2f   : > { %923 = vmatpush.bf16.msra.mxu3 %v1574_v24  ;;  %v259_v56 = vld [vmem:[%s2363_s22 + $0x18] sm:$0xff]  ;;  %v2385_v59 = vpack.c.bf16 %v263_v55, %v256_v51  ;;  %v264_v61 = vld [vmem:[%s2363_s22 + $0x40] sm:$0xff]  ;;  %v1875_v62 = vld [vmem:[%s2827_s1 + $0x2e4] sm:$0xf0]  ;;  %s2792_s13 = scalar_lea.vmem (%p2126_p4), %s2831_s5, %s1880_s10  }
  0x30   : > { %895 = vmatpush.bf16.msra.mxu1 %v1446_v28  ;;  %v2392_v63 = vpack.c.bf16 %v266_v57, %v259_v56  ;;  %v1810_v1 = vld [vmem:[%s2827_s1 + $0xe4] sm:$0xf]  ;;  %v1487_v2 = vld [vmem:[%s2827_s1 + $0xe8] sm:$0xf0]  ;;  %v2400_v4 = vpack.c.bf16 %v264_v61, %v257_v60  ;;  %v1669_v5 = vld [vmem:[%s2827_s1 + $0x250] sm:$0xf]  ;;  %v1742_v7 = vor.u32 %v1875_v62, %v1741_v52 }
  0x31   : > { %882 = vmatpush.bf16.msra.mxu0 %v1374_v34  ;;  %v1857_v6 = vld [vmem:[%s2827_s1 + $0x254] sm:$0xf0]  ;;  %v1792_v8 = vld [vmem:[%s2827_s1 + $0x54] sm:$0xf]  ;;  %v1415_v9 = vld [vmem:[%s2827_s1 + $0x58] sm:$0xf0]  ;;  %v1490_v10 = vor.u32 %v1810_v1, %v1487_v2 }
  0x32   : > { %910 = vmatpush.bf16.msra.mxu2 %v1502_v37  ;;  %v1733_v11 = vld [vmem:[%s2827_s1 + $0x2d0] sm:$0xf]  ;;  %v1873_v12 = vld [vmem:[%s2827_s1 + $0x2d4] sm:$0xf0]  ;;  %v1670_v13 = vor.u32 %v1857_v6, %v1669_v5  ;;  %v1808_v14 = vld [vmem:[%s2827_s1 + $0xd4] sm:$0xf]  ;;  %v1418_v16 = vor.u32 %v1792_v8, %v1415_v9 }
  0x33   : > { %924 = vmatpush.bf16.msra.mxu3 %v1566_v38  ;;  %v1479_v15 = vld [vmem:[%s2827_s1 + $0xd8] sm:$0xf0]  ;;  %v1661_v17 = vld [vmem:[%s2827_s1 + $0x240] sm:$0xf]  ;;  %v1855_v18 = vld [vmem:[%s2827_s1 + $0x244] sm:$0xf0]  ;;  %v1734_v19 = vor.u32 %v1873_v12, %v1733_v11 }
  0x34   : > { %896 = vmatpush.bf16.msra.mxu1 %v1438_v47  ;;  %883 = vmatmul.bf16.vlgmr.msra.gmra.mxu0 %v2385_v59  ;;  %v1790_v20 = vld [vmem:[%s2827_s1 + $0x44] sm:$0xf]  ;;  %v1407_v21 = vld [vmem:[%s2827_s1 + $0x48] sm:$0xf0]  ;;  %v1482_v22 = vor.u32 %v1808_v14, %v1479_v15  ;;  %v1725_v23 = vld [vmem:[%s2827_s1 + $0x2c0] sm:$0xf]  ;;  %v1662_v25 = vor.u32 %v1855_v18, %v1661_v17 }
  0x35   : > { %931 = vmatpush.bf16.msrb.mxu0 %v1686_v42  ;;  %911 = vmatmul.bf16.vlgmr.msra.gmra.mxu2 %v2380_v53  ;;  %v1871_v24 = vld [vmem:[%s2827_s1 + $0x2c4] sm:$0xf0]  ;;  %v1806_v26 = vld [vmem:[%s2827_s1 + $0xc4] sm:$0xf]  ;;  %v1471_v27 = vld [vmem:[%s2827_s1 + $0xc8] sm:$0xf0]  ;;  %v1410_v28 = vor.u32 %v1790_v20, %v1407_v21 }
  0x36   : > { %966 = vmatpush.bf16.msrb.mxu2 %v1758_v50  ;;  %925 = vmatmul.bf16.vlgmr.msra.gmra.mxu3 %v2392_v63  ;;  %v1653_v29 = vld [vmem:[%s2827_s1 + $0x230] sm:$0xf]  ;;  %v1853_v30 = vld [vmem:[%s2827_s1 + $0x234] sm:$0xf0]  ;;  %v1726_v31 = vor.u32 %v1871_v24, %v1725_v23  ;;  %v1788_v32 = vld [vmem:[%s2827_s1 + $0x34] sm:$0xf]  ;;  %v1474_v34 = vor.u32 %v1806_v26, %v1471_v27 }
  0x37   : > { %973 = vmatpush.bf16.msrb.mxu3 %v1434_v43  ;;  %897 = vmatmul.bf16.vlgmr.msra.gmra.mxu1 %v2400_v4  ;;  %v1399_v33 = vld [vmem:[%s2827_s1 + $0x38] sm:$0xf0]  ;;  %v1717_v35 = vld [vmem:[%s2827_s1 + $0x2b0] sm:$0xf]  ;;  %v1869_v36 = vld [vmem:[%s2827_s1 + $0x2b4] sm:$0xf0]  ;;  %v1654_v38 = vor.u32 %v1853_v30, %v1653_v29 }
  0x38   : > { %945 = vmatpush.bf16.msrb.mxu1 %v1750_v54  ;;  %v1804_v37 = vld [vmem:[%s2827_s1 + $0xb4] sm:$0xf]  ;;  %v1463_v39 = vld [vmem:[%s2827_s1 + $0xb8] sm:$0xf0]  ;;  %v269_v41 = vld [vmem:[%s2363_s22 + $0x68] sm:$0xff]  ;;  %v1402_v42 = vor.u32 %v1788_v32, %v1399_v33  ;;  %v1718_v45 = vor.u32 %v1869_v36, %v1717_v35 }
  0x39   : > { %932 = vmatpush.bf16.msrb.mxu0 %v1678_v0  ;;  %v262_v40 = vld [vmem:[%s2363_s22 + $0x30] sm:$0xff]  ;;  %v1645_v43 = vld [vmem:[%s2827_s1 + $0x220] sm:$0xf]  ;;  %v1851_v44 = vld [vmem:[%s2827_s1 + $0x224] sm:$0xf0]  ;;  %v1466_v49 = vor.u32 %v1804_v37, %v1463_v39 }
  0x3a   : > { %987 = vmatpush.bf16.msra.mxu2 %v1498_v58  ;;  %v1786_v46 = vld [vmem:[%s2827_s1 + $0x24] sm:$0xf]  ;;  %v1391_v47 = vld [vmem:[%s2827_s1 + $0x28] sm:$0xf0]  ;;  %v2492_v48 = vpack.c.bf16 %v269_v41, %v262_v40  ;;  %v1709_v50 = vld [vmem:[%s2827_s1 + $0x2a0] sm:$0xf]  ;;  %v1646_v52 = vor.u32 %v1851_v44, %v1645_v43 }
  0x3b   : > { %974 = vmatpush.bf16.msrb.mxu3 %v1426_v3  ;;  %v1867_v51 = vld [vmem:[%s2827_s1 + $0x2a4] sm:$0xf0]  ;;  %v1802_v54 = vld [vmem:[%s2827_s1 + $0xa4] sm:$0xf]  ;;  %v1455_v55 = vld [vmem:[%s2827_s1 + $0xa8] sm:$0xf0]  ;;  %v1394_v56 = vor.u32 %v1786_v46, %v1391_v47 }
  0x3c   : > { %946 = vmatpush.bf16.msrb.mxu1 %v1742_v7  ;;  %v1637_v57 = vld [vmem:[%s2827_s1 + $0x210] sm:$0xf]  ;;  %v1849_v58 = vld [vmem:[%s2827_s1 + $0x214] sm:$0xf0]  ;;  %v1784_v60 = vld [vmem:[%s2827_s1 + $0x14] sm:$0xf]  ;;  %v1710_v61 = vor.u32 %v1867_v51, %v1709_v50  ;;  %v1458_v2 = vor.u32 %v1802_v54, %v1455_v55 }
  0x3d   : > { %933 = vmatpush.bf16.msrb.mxu0 %v1670_v13  ;;  %v1383_v62 = vld [vmem:[%s2827_s1 + $0x18] sm:$0xf0]  ;;  %v1701_v0 = vld [vmem:[%s2827_s1 + $0x290] sm:$0xf]  ;;  %v1865_v1 = vld [vmem:[%s2827_s1 + $0x294] sm:$0xf0]  ;;  %v1638_v7 = vor.u32 %v1849_v58, %v1637_v57 }
  0x3e   : > { %988 = vmatpush.bf16.msra.mxu2 %v1490_v10  ;;  %v1800_v3 = vld [vmem:[%s2827_s1 + $0x94] sm:$0xf]  ;;  %v1447_v5 = vld [vmem:[%s2827_s1 + $0x98] sm:$0xf0]  ;;  %v1629_v6 = vld [vmem:[%s2827_s1 + $0x200] sm:$0xf]  ;;  %v1386_v11 = vor.u32 %v1784_v60, %v1383_v62  ;;  %v1702_v15 = vor.u32 %v1865_v1, %v1701_v0 }
  0x3f   : > { %975 = vmatpush.bf16.msrb.mxu3 %v1418_v16  ;;  %v1847_v8 = vld [vmem:[%s2827_s1 + $0x204] sm:$0xf0]  ;;  %v1782_v9 = vld [vmem:[%s2827_s1 + $0x4] sm:$0xf]  ;;  %v1375_v10 = vld [vmem:[%s2827_s1 + $0x8] sm:$0xf0] }
  0x40   : > { %947 = vmatpush.bf16.msrb.mxu1 %v1734_v19  ;;  %v1828_v12 = vld [vmem:[%s2827_s1 + $0x174] sm:$0xf]  ;;  %v1559_v13 = vld [vmem:[%s2827_s1 + $0x178] sm:$0xf0]  ;;  %v1693_v17 = vld [vmem:[%s2827_s1 + $0x280] sm:$0xf]  ;;  %v1450_v19 = vor.u32 %v1800_v3, %v1447_v5  ;;  %v1630_v23 = vor.u32 %v1847_v8, %v1629_v6  ;;  %v1378_v27 = vor.u32 %v1782_v9, %v1375_v10 }
  0x41   : > { %934 = vmatpush.bf16.msrb.mxu0 %v1662_v25  ;;  %v1860_v14 = vld [vmem:[%s2827_s1 + $0x274] sm:$0xf]  ;;  %v1687_v16 = vld [vmem:[%s2827_s1 + $0x278] sm:$0xf0]  ;;  %v1863_v18 = vld [vmem:[%s2827_s1 + $0x284] sm:$0xf0] }
  0x42   : > { %989 = vmatpush.bf16.msra.mxu2 %v1482_v22  ;;  %v260_v20 = vld [vmem:[%s2363_s22 + $0x20] sm:$0xff]  ;;  %v267_v21 = vld [vmem:[%s2363_s22 + $0x58] sm:$0xff]  ;;  %v1439_v24 = vld [vmem:[%s2827_s1 + $0x88] sm:$0xf0]  ;;  %v1690_v32 = vor.u32 %v1860_v14, %v1687_v16  ;;  %v1694_v33 = vor.u32 %v1863_v18, %v1693_v17 }
  0x43   : > { %976 = vmatpush.bf16.msrb.mxu3 %v1410_v28  ;;  %v1798_v22 = vld [vmem:[%s2827_s1 + $0x84] sm:$0xf]  ;;  %v1844_v25 = vld [vmem:[%s2827_s1 + $0x1f4] sm:$0xf]  ;;  %v1623_v26 = vld [vmem:[%s2827_s1 + $0x1f8] sm:$0xf0]  ;;  %v1562_v28 = vor.u32 %v1828_v12, %v1559_v13  ;;  %v2590_v37 = vpack.c.bf16 %v267_v21, %v260_v20 }
  0x44   : > { %948 = vmatpush.bf16.msrb.mxu1 %v1726_v31  ;;  %v1876_v29 = vld [vmem:[%s2827_s1 + $0x2f4] sm:$0xf]  ;;  %v1751_v30 = vld [vmem:[%s2827_s1 + $0x2f8] sm:$0xf0]  ;;  %v261_v31 = vld [vmem:[%s2363_s22 + $0x28] sm:$0xff]  ;;  %v1626_v41 = vor.u32 %v1844_v25, %v1623_v26 }
  0x45   : > { %935 = vmatpush.bf16.msrb.mxu0 %v1654_v38  ;;  %1763 = vmatmul.msk.bf16.vlgmr.msrb.gmra.mxu2 %vm871_vm0, %v2492_v48  ;;  %v1826_v35 = vld [vmem:[%s2827_s1 + $0x164] sm:$0xf]  ;;  %v1551_v36 = vld [vmem:[%s2827_s1 + $0x168] sm:$0xf0]  ;;  %v1442_v38 = vor.u32 %v1798_v22, %v1439_v24  ;;  %v1824_v51 = vld [vmem:[%s2827_s1 + $0x154] sm:$0xf] }
  0x46   : > { %990 = vmatpush.bf16.msra.mxu2 %v1474_v34  ;;  %v268_v34 = vld [vmem:[%s2363_s22 + $0x60] sm:$0xff]  ;;  %v1679_v40 = vld [vmem:[%s2827_s1 + $0x268] sm:$0xf0]  ;;  %v1856_v54 = vld [vmem:[%s2827_s1 + $0x254] sm:$0xf]  ;;  %s1368_s22 = sshll.u32 %s230_s8, 4 }
  0x47   : > { %977 = vmatpush.bf16.msrb.mxu3 %v1402_v42  ;;  %v1858_v39 = vld [vmem:[%s2827_s1 + $0x264] sm:$0xf]  ;;  %v1754_v42 = vor.u32 %v1876_v29, %v1751_v30  ;;  %v2601_v44 = vpack.c.bf16 %v268_v34, %v261_v31  ;;  %v1615_v46 = vld [vmem:[%s2827_s1 + $0x1e8] sm:$0xf0]  ;;  %v1671_v55 = vld [vmem:[%s2827_s1 + $0x258] sm:$0xf0] }
  0x48   : > { %949 = vmatpush.bf16.msrb.mxu1 %v1718_v45  ;;  %v1842_v43 = vld [vmem:[%s2827_s1 + $0x1e4] sm:$0xf]  ;;  %v1554_v45 = vor.u32 %v1826_v35, %v1551_v36  ;;  %v1682_v50 = vor.u32 %v1858_v39, %v1679_v40  ;;  %v1840_v58 = vld [vmem:[%s2827_s1 + $0x1d4] sm:$0xf]  ;;  %v1735_v0 = vld [vmem:[%s2827_s1 + $0x2d8] sm:$0xf0]  ;;  %v1674_v1 = vor.u32 %v1856_v54, %v1671_v55 }
  0x49   : > { %936 = vmatpush.bf16.msrb.mxu0 %v1646_v52  ;;  %v1874_v47 = vld [vmem:[%s2827_s1 + $0x2e4] sm:$0xf]  ;;  %v1543_v52 = vld [vmem:[%s2827_s1 + $0x158] sm:$0xf0]  ;;  %v1872_v62 = vld [vmem:[%s2827_s1 + $0x2d4] sm:$0xf] }
  0x4a   : > { %991 = vmatpush.bf16.msra.mxu2 %v1466_v49  ;;  %v1743_v49 = vld [vmem:[%s2827_s1 + $0x2e8] sm:$0xf0]  ;;  %v1546_v60 = vor.u32 %v1824_v51, %v1543_v52  ;;  %v1854_v5 = vld [vmem:[%s2827_s1 + $0x244] sm:$0xf]  ;;  %v1738_v8 = vor.u32 %v1872_v62, %v1735_v0  ;;  %v1820_v13 = vld [vmem:[%s2827_s1 + $0x134] sm:$0xf] }
  0x4b   : > { %978 = vmatpush.bf16.msrb.mxu3 %v1394_v56  ;;  %v1618_v56 = vor.u32 %v1842_v43, %v1615_v46  ;;  %v1746_v57 = vor.u32 %v1874_v47, %v1743_v49  ;;  %v1535_v3 = vld [vmem:[%s2827_s1 + $0x148] sm:$0xf0]  ;;  %v1838_v9 = vld [vmem:[%s2827_s1 + $0x1c4] sm:$0xf]  ;;  %v1527_v14 = vld [vmem:[%s2827_s1 + $0x138] sm:$0xf0] }
  0x4c   : > { %950 = vmatpush.bf16.msrb.mxu1 %v1710_v61  ;;  %v1607_v61 = vld [vmem:[%s2827_s1 + $0x1d8] sm:$0xf0]  ;;  %v1663_v6 = vld [vmem:[%s2827_s1 + $0x248] sm:$0xf0]  ;;  %v1530_v20 = vor.u32 %v1820_v13, %v1527_v14  ;;  %v1868_v22 = vld [vmem:[%s2827_s1 + $0x2b4] sm:$0xf] }
  0x4d   : > { %937 = vmatpush.bf16.msrb.mxu0 %v1638_v7  ;;  %v1610_v7 = vor.u32 %v1840_v58, %v1607_v61  ;;  %v1599_v10 = vld [vmem:[%s2827_s1 + $0x1c8] sm:$0xf0]  ;;  %v1666_v12 = vor.u32 %v1854_v5, %v1663_v6  ;;  %v1655_v16 = vld [vmem:[%s2827_s1 + $0x238] sm:$0xf0]  ;;  %v1818_v25 = vld [vmem:[%s2827_s1 + $0x124] sm:$0xf] }
  0x4e   : > { %992 = vmatpush.bf16.msra.mxu2 %v1458_v2  ;;  %v1822_v2 = vld [vmem:[%s2827_s1 + $0x144] sm:$0xf]  ;;  %v1602_v17 = vor.u32 %v1838_v9, %v1599_v10  ;;  %v1591_v21 = vld [vmem:[%s2827_s1 + $0x1b8] sm:$0xf0]  ;;  %v1519_v26 = vld [vmem:[%s2827_s1 + $0x128] sm:$0xf0] }
  0x4f   : > { %979 = vmatpush.bf16.msrb.mxu3 %v1386_v11  ;;  %v1870_v11 = vld [vmem:[%s2827_s1 + $0x2c4] sm:$0xf]  ;;  %v1711_v35 = vld [vmem:[%s2827_s1 + $0x2a8] sm:$0xf0]  ;;  %v1511_v39 = vld [vmem:[%s2827_s1 + $0x118] sm:$0xf0] }
  0x50   : > { %951 = vmatpush.bf16.msrb.mxu1 %v1702_v15  ;;  %v1852_v15 = vld [vmem:[%s2827_s1 + $0x234] sm:$0xf]  ;;  %v1834_v31 = vld [vmem:[%s2827_s1 + $0x1a4] sm:$0xf]  ;;  %v1575_v47 = vld [vmem:[%s2827_s1 + $0x198] sm:$0xf0] }
  0x51   : > { %938 = vmatpush.bf16.msrb.mxu0 %v1630_v23  ;;  %v1719_v23 = vld [vmem:[%s2827_s1 + $0x2b8] sm:$0xf0]  ;;  %v1658_v24 = vor.u32 %v1852_v15, %v1655_v16  ;;  %v1866_v34 = vld [vmem:[%s2827_s1 + $0x2a4] sm:$0xf]  ;;  %v1848_v40 = vld [vmem:[%s2827_s1 + $0x214] sm:$0xf] }
  0x52   : > { %993 = vmatpush.bf16.msra.mxu2 %v1450_v19  ;;  %v1836_v19 = vld [vmem:[%s2827_s1 + $0x1b4] sm:$0xf]  ;;  %v1722_v30 = vor.u32 %v1868_v22, %v1719_v23  ;;  %v1714_v43 = vor.u32 %v1866_v34, %v1711_v35  ;;  %v1814_v52 = vld [vmem:[%s2827_s1 + $0x104] sm:$0xf]  ;;  %v1503_v54 = vld [vmem:[%s2827_s1 + $0x108] sm:$0xf0] }
  0x53   : > { %980 = vmatpush.bf16.msrb.mxu3 %v1378_v27  ;;  %v1850_v27 = vld [vmem:[%s2827_s1 + $0x224] sm:$0xf]  ;;  %v1594_v29 = vor.u32 %v1836_v19, %v1591_v21  ;;  %v1864_v49 = vld [vmem:[%s2827_s1 + $0x294] sm:$0xf]  ;;  %v1759_v58 = vld [vmem:[%s2827_s1 + $0x308] sm:$0xf0]  ;;  %v1506_v62 = vor.u32 %v1814_v52, %v1503_v54 }
  0x54   : > { %952 = vmatpush.bf16.msrb.mxu1 %v1694_v33  ;;  %939 = vmatmul.bf16.vlgmr.msrb.gmra.mxu0 %v2590_v37  ;;  %v1583_v33 = vld [vmem:[%s2827_s1 + $0x1a8] sm:$0xf0]  ;;  %v1846_v55 = vld [vmem:[%s2827_s1 + $0x204] sm:$0xf]  ;;  %s2779_s9 = scalar_lea.vmem [#allocation3], %s1368_s22  }
  0x55   : > { %1001 = vmatpush.bf16.msra.mxu0 %v1562_v28  ;;  %v1647_v28 = vld [vmem:[%s2827_s1 + $0x228] sm:$0xf0]  ;;  %v1830_v0 = vld [vmem:[%s2827_s1 + $0x184] sm:$0xf] }
  0x56   : > { %994 = vmatpush.bf16.msra.mxu2 %v1442_v38  ;;  %981 = vmatmul.bf16.vlgmr.msrb.gmra.mxu3 %v2385_v59  ;;  %v1727_v59 = vld [vmem:[%s2827_s1 + $0x2c8] sm:$0xf0]  ;;  %v1650_v36 = vor.u32 %v1850_v27, %v1647_v28  ;;  %v1816_v38 = vld [vmem:[%s2827_s1 + $0x114] sm:$0xf] }
  0x57   : > { %1029 = vmatpush.bf16.msra.mxu3 %v1690_v32  ;;  %953 = vmatmul.bf16.vlgmr.msrb.gmra.mxu1 %v2601_v44  ;;  %v1730_v18 = vor.u32 %v1870_v11, %v1727_v59  ;;  %v1522_v32 = vor.u32 %v1818_v25, %v1519_v26  ;;  %v1514_v46 = vor.u32 %v1816_v38, %v1511_v39  ;;  %v1695_v5 = vld [vmem:[%s2827_s1 + $0x288] sm:$0xf0] }
  0x58   : > { %1015 = vmatpush.bf16.msra.mxu1 %v1626_v41  ;;  %v1639_v41 = vld [vmem:[%s2827_s1 + $0x218] sm:$0xf0] }
  0x59   : > { %1002 = vmatpush.bf16.msra.mxu0 %v1554_v45  ;;  %995 = vmatmul.bf16.vlgmr.msra.gmra.mxu2 %v2400_v4  ;;  %v1538_v4 = vor.u32 %v1822_v2, %v1535_v3  ;;  %v1832_v45 = vld [vmem:[%s2827_s1 + $0x194] sm:$0xf]  ;;  %v1642_v51 = vor.u32 %v1848_v40, %v1639_v41  ;;  %v1862_v3 = vld [vmem:[%s2827_s1 + $0x284] sm:$0xf] }
  0x5a   : > { %1043 = vmatpush.bf16.msrb.mxu2 %v1754_v42  ;;  %v1586_v42 = vor.u32 %v1834_v31, %v1583_v33 }
  0x5b   : > { %1030 = vmatpush.bf16.msra.mxu3 %v1682_v50  ;;  %v1703_v50 = vld [vmem:[%s2827_s1 + $0x298] sm:$0xf0] }
  0x5c   : > { %1016 = vmatpush.bf16.msra.mxu1 %v1618_v56  ;;  %v1631_v56 = vld [vmem:[%s2827_s1 + $0x208] sm:$0xf0]  ;;  %v1706_v61 = vor.u32 %v1864_v49, %v1703_v50 }
  0x5d   : > { %1003 = vmatpush.bf16.msra.mxu0 %v1546_v60  ;;  %v1578_v60 = vor.u32 %v1832_v45, %v1575_v47  ;;  %v1634_v2 = vor.u32 %v1846_v55, %v1631_v56  ;;  %v1083_v56 = vld [vmem:[%s2829_s3] sm:$0x3] }
  0x5e   : > { %1044 = vmatpush.bf16.msrb.mxu2 %v1746_v57  ;;  %v1878_v57 = vld [vmem:[%s2827_s1 + $0x304] sm:$0xf] }
  0x5f   : > { %1031 = vmatpush.bf16.msra.mxu3 %v1674_v1  ;;  %v1567_v1 = vld [vmem:[%s2827_s1 + $0x188] sm:$0xf0]  ;;  %v1762_v6 = vor.u32 %v1878_v57, %v1759_v58 }
  0x60   : > { %1017 = vmatpush.bf16.msra.mxu1 %v1610_v7  ;;  %v1570_v7 = vor.u32 %v1830_v0, %v1567_v1  ;;  %v1085_v0 = vperm.slane %v1083_v56, 0  ;;  %v1086_v1 = vperm.slane %v1083_v56, 1 }
  0x61   : > { %1004 = vmatpush.bf16.msra.mxu0 %v1538_v4 }
  0x62   : > { %1045 = vmatpush.bf16.msrb.mxu2 %v1738_v8  ;;  %v1698_v8 = vor.u32 %v1862_v3, %v1695_v5 }
  0x63   : > { %1032 = vmatpush.bf16.msra.mxu3 %v1666_v12 }
  0x64   : > { %1018 = vmatpush.bf16.msra.mxu1 %v1602_v17 }
  0x65   : > { %1005 = vmatpush.bf16.msra.mxu0 %v1530_v20 }
  0x66   : > { %1046 = vmatpush.bf16.msrb.mxu2 %v1730_v18 }
  0x67   : > { %1033 = vmatpush.bf16.msra.mxu3 %v1658_v24 }
  0x68   : > { %1019 = vmatpush.bf16.msra.mxu1 %v1594_v29 }
  0x69   : > { %1006 = vmatpush.bf16.msra.mxu0 %v1522_v32 }
  0x6a   : > { %1047 = vmatpush.bf16.msrb.mxu2 %v1722_v30 }
  0x6b   : > { %1034 = vmatpush.bf16.msra.mxu3 %v1650_v36 }
  0x6c   : > { %1020 = vmatpush.bf16.msra.mxu1 %v1586_v42 }
  0x6d   : > { %1007 = vmatpush.bf16.msra.mxu0 %v1514_v46 }
  0x6e   : > { %1048 = vmatpush.bf16.msrb.mxu2 %v1714_v43 }
  0x6f   : > { %1035 = vmatpush.bf16.msra.mxu3 %v1642_v51 }
  0x70   : > { %1021 = vmatpush.bf16.msra.mxu1 %v1578_v60 }
  0x71   : > { %1008 = vmatpush.bf16.msra.mxu0 %v1506_v62 }
  0x72   : > { %1049 = vmatpush.bf16.msrb.mxu2 %v1706_v61 }
  0x73   : > { %1036 = vmatpush.bf16.msra.mxu3 %v1634_v2 }
  0x74   : > { %1022 = vmatpush.bf16.msra.mxu1 %v1570_v7  ;;  %1009 = vmatmul.bf16.vlgmr.msra.gmra.mxu0 %v2380_v53  ;;  %v375_v53 = vld [vmem:[%s2828_s2] sm:$0x3] }
  0x75   : > { %1064 = vmatpush.bf16.msrb.mxu0 %v1762_v6  ;;  %v377_v16 = vperm.slane %v375_v53, 0  ;;  %v378_v21 = vperm.slane %v375_v53, 1 }
  0x76   : > { %1037 = vmatmul.bf16.vlgmr.msra.gmra.mxu3 %v2590_v37  ;;  %1050 = vmatpush.bf16.msrb.mxu2 %v1698_v8 }
  0x77   : > { %1023 = vmatmul.bf16.vlgmr.msra.gmra.mxu1 %v2392_v63 }
  0x79   : > { %1051 = vmatmul.bf16.vlgmr.msrb.gmra.mxu2 %v2601_v44 }
  0x84   : > { %1764 = vmatmul.msk.bf16.vlgmr.msrb.gmra.mxu0 %vm871_vm0, %v2492_v48 }
  0xb1   : > { %v884_v4 = vpop.f32.mrf.mxu0 }
  0xb2   : > { %v885_v17 = vadd.f32 %v884_v4, %v377_v16 }
  0xb4   : > { %v898_v11 = vpop.f32.mrf.mxu1 }
  0xb5   : > { %v899_v48 = vadd.f32 %v898_v11, %v885_v17 }
  0xb8   : > { %v912_v9 = vpop.f32.mrf.mxu2 }
  0xb9   : > { %v926_v59 = vpop.f32.mrf.mxu3  ;;  %v886_v13 = vpop.f32.mrf.mxu0  ;;  %v913_v22 = vadd.f32 %v912_v9, %v899_v48 }
  0xba   : > { %v887_v24 = vadd.f32 %v886_v13, %v377_v16  ;;  %v1100_v16 = vstv %s1099_s6 }
  0xbb   : > { %v927_v27 = vadd.f32 %v926_v59, %v913_v22 }
  0xbc   : > { %v900_v14 = vpop.f32.mrf.mxu1 }
  0xbd   : > { %v901_v29 = vadd.f32 %v900_v14, %v887_v24 }
  0xc0   : > { %v914_v10 = vpop.f32.mrf.mxu2 }
  0xc1   : > { %v928_v37 = vpop.f32.mrf.mxu3  ;;  %v915_v34 = vadd.f32 %v914_v10, %v901_v29 }
  0xc3   : > { %v929_v41 = vadd.f32 %v928_v37, %v915_v34 }
  0xc8   : > { %v968_v12 = vpop.f32.mrf.mxu2 }
  0xd0   : > { %v970_v63 = vpop.f32.mrf.mxu2 }
  0xd1   : > { %v940_v15 = vpop.f32.mrf.mxu0 }
  0xd2   : > { %v941_v31 = vadd.f32 %v940_v15, %v927_v27 }
  0xd4   : > { %v954_v44 = vpop.f32.mrf.mxu1 }
  0xd5   : > { %v955_v36 = vadd.f32 %v954_v44, %v941_v31 }
  0xd7   : > { %v969_v43 = vadd.f32 %v968_v12, %v955_v36 }
  0xd9   : > { %v982_v18 = vpop.f32.mrf.mxu3  ;;  %v942_v19 = vpop.f32.mrf.mxu0  ;;  %v1075_v51 = vmul.f32 0.2, %v969_v43  ;;  %vm1071_vm1 = vcmp.gt.f32.partialorder %v969_v43, 0.0 }
  0xda   : > { %v983_v25 = vadd.f32 %v982_v18, %v378_v21  ;;  %v943_v46 = vadd.f32 %v942_v19, %v929_v41 }
  0xdb   : > { %v1079_v62 = vsel %vm1071_vm1, %v969_v43, %v1075_v51 }
  0xdc   : > { %v996_v20 = vpop.f32.mrf.mxu2  ;;  %v956_v23 = vpop.f32.mrf.mxu1  ;;  %v1089_v8 = vmul.f32 %v1085_v0, %v1079_v62 }
  0xdd   : > { %v997_v30 = vadd.f32 %v996_v20, %v983_v25  ;;  %v957_v54 = vadd.f32 %v956_v23, %v943_v46 }
  0xdf   : > { %v971_v2 = vadd.f32 %v970_v63, %v957_v54 }
  0xe1   : > { %v984_v26 = vpop.f32.mrf.mxu3  ;;  %v1077_v4 = vmul.f32 0.2, %v971_v2  ;;  %vm1073_vm3 = vcmp.gt.f32.partialorder %v971_v2, 0.0 }
  0xe2   : > { %v985_v38 = vadd.f32 %v984_v26, %v378_v21 }
  0xe3   : > { %v1081_v14 = vsel %vm1073_vm3, %v971_v2, %v1077_v4 }
  0xe4   : > { %v998_v32 = vpop.f32.mrf.mxu2  ;;  %v1091_v37 = vmul.f32 %v1085_v0, %v1081_v14 }
  0xe5   : > { %v999_v47 = vadd.f32 %v998_v32, %v985_v38 }
  0xf1   : > { %v1010_v28 = vpop.f32.mrf.mxu0 }
  0xf2   : > { %v1011_v35 = vadd.f32 %v1010_v28, %v997_v30 }
  0xf4   : > { %v1024_v33 = vpop.f32.mrf.mxu1 }
  0xf5   : > { %v1025_v42 = vadd.f32 %v1024_v33, %v1011_v35 }
  0xf9   : > { %v1038_v39 = vpop.f32.mrf.mxu3  ;;  %v1012_v40 = vpop.f32.mrf.mxu0 }
  0xfa   : > { %v1039_v49 = vadd.f32 %v1038_v39, %v1025_v42  ;;  %v1013_v50 = vadd.f32 %v1012_v40, %v999_v47 }
  0xfc   : > { %v1052_v45 = vpop.f32.mrf.mxu2  ;;  %v1026_v52 = vpop.f32.mrf.mxu1 }
  0xfd   : > { %v1053_v55 = vadd.f32 %v1052_v45, %v1039_v49  ;;  %v1027_v60 = vadd.f32 %v1026_v52, %v1013_v50 }
 0x101   : > { %v1040_v57 = vpop.f32.mrf.mxu3  ;;  %v1066_v58 = vpop.f32.mrf.mxu0 }
 0x102   : > { %v1067_v61 = vadd.f32 %v1066_v58, %v1053_v55  ;;  %v1041_v3 = vadd.f32 %v1040_v57, %v1027_v60 }
 0x104   : > { %vm1072_vm2 = vcmp.gt.f32.partialorder %v1067_v61, 0.0  ;;  %v1076_v5 = vmul.f32 0.2, %v1067_v61  ;;  %v1054_v6 = vpop.f32.mrf.mxu2 }
 0x105   : > { %v1055_v10 = vadd.f32 %v1054_v6, %v1041_v3 }
 0x106   : > { %v1080_v7 = vsel %vm1072_vm2, %v1067_v61, %v1076_v5 }
 0x107   : > { %v1090_v9 = vmul.f32 %v1086_v1, %v1080_v7 }
 0x109   : > { %v1068_v11 = vpop.f32.mrf.mxu0  ;;  %v1093_v59 = vadd.f32 %v1090_v9, %v1089_v8 }
 0x10a   : > { %v1069_v12 = vadd.f32 %v1068_v11, %v1055_v10 }
 0x10b   : > { %1094 = vadd.xlane.f32.xlu0 %v1093_v59 }
 0x10c   : > { %vm1074_vm4 = vcmp.gt.f32.partialorder %v1069_v12, 0.0  ;;  %v1078_v13 = vmul.f32 0.2, %v1069_v12 }
 0x10e   : > { %v1082_v53 = vsel %vm1074_vm4, %v1069_v12, %v1078_v13 }
 0x10f   : > { %v1092_v15 = vmul.f32 %v1086_v1, %v1082_v53 }
 0x111   : > { %v1096_v63 = vadd.f32 %v1092_v15, %v1091_v37 }
 0x113   : > { %1097 = vadd.xlane.f32.xlu0 %v1096_v63 }
 0x17e   : > { %v1095_v44 = vpop.xlane.xlu0 %1094 }
 0x17f   : > { %v1101_v17 = vadd.f32 %v1100_v16, %v1095_v44 }
 0x181   : > { %v1103_v18 = vsub.f32 0.0, %v1101_v17 }
 0x183   : > { %v1105_v48 = vmul.f32 1.442695, %v1103_v18 }
 0x185   : > { %1972 = vpow2.f32 %v1105_v48 }
 0x186   : > { %v1098_v19 = vpop.xlane.xlu0 %1097 }
 0x187   : > { %v1102_v20 = vadd.f32 %v1100_v16, %v1098_v19 }
 0x189   : > { %v1104_v21 = vsub.f32 0.0, %v1102_v20 }
 0x18b   : > { %v1973_v22 = vpop.eup %1972  ;;  %v1107_v23 = vmul.f32 1.442695, %v1104_v21 }
 0x18c   : > { %v1109_v24 = vadd.f32 1.0, %v1973_v22 }
 0x18d   : > { %1974 = vpow2.f32 %v1107_v23 }
 0x18e   : > { %1976 = vrcp.f32 %v1109_v24  ;;  %v1122_v30 = vand.u32 2147483648, %v1109_v24  ;;  %v1120_v32 = vand.u32 2147483647, %v1109_v24  ;;  %vm1116_vm6 = vweird.f32 %v1109_v24 }
 0x190   : > { %v1123_v35 = vor.u32 1.1754944e-38, %v1122_v30  ;;  %vm1121_vm9 = vcmp.eq.f32.partialorder %v1120_v32, 8.507059e+37 }
 0x193   : > { %v1975_v25 = vpop.eup %1974 }
 0x194   : > { %v1977_v26 = vpop.eup %1976  ;;  %v1110_v27 = vadd.f32 1.0, %v1975_v25 }
 0x195   : > { %v1112_v28 = vmul.f32 %v1977_v26, %v1109_v24  ;;  %vm1117_vm5 = vweird.f32 %v1977_v26 }
 0x196   : > { %1978 = vrcp.f32 %v1110_v27  ;;  %vm1118_vm8 = vmor %vm1116_vm6, %vm1117_vm5  ;;  %v1137_v41 = vand.u32 2147483648, %v1110_v27  ;;  %v1135_v43 = vand.u32 2147483647, %v1110_v27  ;;  %vm1131_vm11 = vweird.f32 %v1110_v27 }
 0x197   : > { %v1113_v29 = vsub.f32 1.0, %v1112_v28 }
 0x198   : > { %v1138_v46 = vor.u32 1.1754944e-38, %v1137_v41  ;;  %vm1136_vm13 = vcmp.eq.f32.partialorder %v1135_v43, 8.507059e+37 }
 0x199   : > { %v1114_v31 = vmul.f32 %v1977_v26, %v1113_v29 }
 0x19b   : > { %v1115_v33 = vadd.f32 %v1977_v26, %v1114_v31 }
 0x19c   : > { %v1979_v34 = vpop.eup %1978 }
 0x19d   : > { %v1119_v36 = vsel %vm1118_vm8, %v1977_v26, %v1115_v33  ;;  %v1127_v38 = vmul.f32 %v1979_v34, %v1110_v27  ;;  %vm1132_vm10 = vweird.f32 %v1979_v34 }
 0x19e   : > { %v1124_v39 = vsel %vm1121_vm9, %v1123_v35, %v1119_v36  ;;  %vm1133_vm12 = vmor %vm1131_vm11, %vm1132_vm10 }
 0x19f   : > { %1142 = vst.msk [vmem:[%s2779_s9] sm:$0xff] %vm1141_vm7, %v1124_v39  ;;  %v1128_v40 = vsub.f32 1.0, %v1127_v38 }
 0x1a1   : > { %v1129_v42 = vmul.f32 %v1979_v34, %v1128_v40 }
 0x1a3   : > { %v1130_v45 = vadd.f32 %v1979_v34, %v1129_v42  ;;  %1150 = sbr.rel (!%p2126_p4) target bundleno = 463 (0x1cf), region = 44 }
 0x1a5   : > { %v1134_v47 = vsel %vm1133_vm12, %v1979_v34, %v1130_v45 }
 0x1a6   : > { %v1139_v49 = vsel %vm1136_vm13, %v1138_v46, %v1134_v47 }
 0x1a7   : > { %1143 = vst.msk [vmem:[%s2779_s9 + $0x8] sm:$0xff] %vm1141_vm7, %v1139_v49 }
 0x1a8   : > { %s2837_s20 = smov (!%p1153_p8, %s1152_s20), 2 }
 0x1a9   : > { %s1767_s14 = sshll.u32 %s2837_s20, 3 }
 0x1aa   : > { %p1770_p9 = scmp.eq.s32.totalorder %s1767_s14, 0 }
 0x1ab   : > { %s2798_s15 = sshrl.u32 (!%p1770_p9), %s2837_s20, 1 }
 0x1ac   : > { %1161 = sbr.rel (%p1770_p9) target bundleno = 463 (0x1cf), region = 48  ;;  %p1771_p10 = scmp.le.s32.totalorder (!%p1770_p9), %s2798_s15, 0 }
 0x1b1   : > { %1320 = sbr.rel (%p1771_p10) target bundleno = 446 (0x1be), region = 124  ;;  %s2036_s4 = smov (!%p1771_p10), %s2792_s13  }
 0x1b2   : > { %s2040_s27 = smov (!%p1771_p10), %s2779_s9   ;;  %s2044_s19 = smov (!%p1771_p10), 0  }
 0x1b3   : > { %s2048_s16 = smov (!%p1771_p10), 0  }
 0x1b6 LB: >> { %v1226_v50 = vld [vmem:[%s2042_s27] sm:$0xff]  ;;  %v1228_v51 = vld [vmem:[%s2042_s27 + $0x8] sm:$0xff]  ;;  %s1230_s17 = sadd.s32 1, %s2046_s19  ;;  %s1220_s16 = sadd.s32 1, %s2050_s16   ;;  %s2050_s16 = sphi %s2048_s16, %s1220_s16   ;;  %s2046_s19 = sphi %s2044_s19, %s2045_s19   ;;  %s2042_s27 = sphi %s2040_s27, %s1235_s27   ;;  %s2038_s4 = sphi %s2036_s4, %s1236_s4  }
 0x1b7   : >> { %1227 = vst [vmem:[%s2038_s4] sm:$0xff] %v1226_v50  ;;  %p1231_p11 = scmp.ge.s32.totalorder %s1230_s17, %s2798_s15  ;;  %p1219_p12 = scmp.ge.s32.totalorder %s1220_s16, %s2798_s15 }
 0x1b8   : >> { %1229 = vst [vmem:[%s2038_s4 + $0x8] sm:$0xff] %v1228_v51 }
 0x1b9   : >> { %s2839_s17 = smov (%p1231_p11, %s1230_s17), 0  ;;  %1222 = sbr.rel (!%p1219_p12) target bundleno = 438 (0x1b6), region = 130 }
 0x1ba   : >> { %s1772_s18 = sshll.u32 %s2839_s17, 4  ;;  %s2045_s19 = smov %s2839_s17  }
 0x1bb   : >> { %s1235_s27 = scalar_lea.vmem %s2779_s9, %s1772_s18 [#allocation3]   ;;  %s1236_s4 = scalar_lea.vmem %s2792_s13, %s1772_s18  }
 0x1be PF: > { %s2808_s24 = sand.u32 1, %s2837_s20   ;;  %s1881_s25 = sshll.u32 %s2798_s15, 4 }
 0x1bf   : > { %s1241_s28 = scalar_lea.vmem %s2779_s9, %s1881_s25 [#allocation3]   ;;  %s1243_s29 = scalar_lea.vmem %s2792_s13, %s1881_s25  }
 0x1c0   : > { %p1777_p13 = scmp.le.s32.totalorder %s2808_s24, 0 }
 0x1c1   : > { %s2052_s30 = smov (!%p1777_p13), %s1243_s29   ;;  %s2056_s7 = smov (!%p1777_p13), %s1241_s28  }
 0x1c2   : > { %1334 = sbr.rel (%p1777_p13) target bundleno = 463 (0x1cf), region = 135  ;;  %s2060_s6 = smov (!%p1777_p13), 0  }
 0x1c3   : > { %s2064_s8 = smov (!%p1777_p13), 0  }
 0x1c7 LB: >> { %v1253_v52 = vld [vmem:[%s2058_s7] sm:$0xff]  ;;  %s1255_s22 = sadd.s32 1, %s2062_s6  ;;  %s1247_s8 = sadd.s32 1, %s2066_s8   ;;  %s2066_s8 = sphi %s2064_s8, %s1247_s8   ;;  %s2062_s6 = sphi %s2060_s6, %s2061_s6   ;;  %s2058_s7 = sphi %s2056_s7, %s1260_s7   ;;  %s2054_s30 = sphi %s2052_s30, %s1261_s30  }
 0x1c8   : >> { %1254 = vst [vmem:[%s2054_s30] sm:$0xff] %v1253_v52  ;;  %p1256_p0 = scmp.ge.s32.totalorder %s1255_s22, %s2808_s24  ;;  %p1246_p1 = scmp.ge.s32.totalorder %s1247_s8, %s2808_s24 }
 0x1ca   : >> { %s2841_s22 = smov (%p1256_p0, %s1255_s22), 0  ;;  %1249 = sbr.rel (!%p1246_p1) target bundleno = 455 (0x1c7), region = 141 }
 0x1cb   : >> { %s1778_s9 = sshll.u32 %s2841_s22, 3  ;;  %s2061_s6 = smov %s2841_s22  }
 0x1cc   : >> { %s1260_s7 = scalar_lea.vmem %s1241_s28, %s1778_s9 [#allocation3]   ;;  %s1261_s30 = scalar_lea.vmem %s1243_s29, %s1778_s9  }
 0x1cf PF: > { %p13_p2 = scmp.ge.s32.totalorder %s2116_s23, 4   ;;  %s2833_s20 = smov %s2030_s21 }
 0x1d0   : > { %s2834_s21 = smov %s2124_s26  ;;  %s2835_s22 = smov %s2116_s23 }
 0x1d1   :  { %15 = sbr.rel (!%p13_p2) target bundleno = 4 (0x4), region = 152 }

</bundles_post_ra>
